<compile_context>
chip_gen: v6e
topology: v6e:2x2x1
jax: 0.10.0
libtpu: 0.0.40
codegen_flags: <defaults>
</compile_context>

<pallas_src>
import functools

import jax
import jax.numpy as jnp
from jax.experimental import pallas as pl
from jax.experimental.pallas import tpu as pltpu

_LANES = 128
_MAX_ROWS_PER_TILE = 8192  # 8192 * 128 * 4 B = 4 MiB per f32 input block


def _iou_kernel(pred_ref, target_ref, out_ref, acc_prod, acc_sum,
                *, tr, n_rows, mask_last_tile):
    t_idx = pl.program_id(1)
    n_t = pl.num_programs(1)

    @pl.when(t_idx == 0)
    def _():
        acc_prod[...] = jnp.zeros_like(acc_prod)
        acc_sum[...] = jnp.zeros_like(acc_sum)

    p = pred_ref[0].astype(jnp.float32)    # (tr, 128)
    t = target_ref[0].astype(jnp.float32)  # (tr, 128)

    def accumulate(p_v, t_v):
        # Per-lane / per-sublane tree reduce into one vreg: summing over
        # groups of 8 rows is pure VALU work (no XLU), and the accumulator
        # RMW touches a single (8, 128) vreg per quantity.
        acc_prod[...] += jnp.sum((t_v * p_v).reshape(tr // 8, 8, _LANES), axis=0)
        acc_sum[...] += jnp.sum((t_v + p_v).reshape(tr // 8, 8, _LANES), axis=0)

    if mask_last_tile:
        # Partial last pixel tile: rows >= valid hold unspecified data (there
        # is no wrapper pad anymore) and MUST be zeroed before accumulating.
        # Non-last tiles take the lean, unmasked path.
        @pl.when(t_idx < n_t - 1)
        def _():
            accumulate(p, t)

        @pl.when(t_idx == n_t - 1)
        def _():
            valid = n_rows - t_idx * tr
            row_ids = jax.lax.broadcasted_iota(jnp.int32, (tr, _LANES), 0)
            keep = row_ids < valid
            accumulate(jnp.where(keep, p, 0.0), jnp.where(keep, t, 0.0))
    else:
        accumulate(p, t)

    @pl.when(t_idx == n_t - 1)
    def _():
        iand = jnp.sum(acc_prod[...])
        total = jnp.sum(acc_sum[...])
        union = total - iand
        # Exact divide (runs once per sample); NaN/Inf behavior for union==0
        # matches the PyTorch reference (do NOT use approx reciprocal here).
        loss = 1.0 - iand / union
        out_ref[...] = jnp.broadcast_to(loss, (1, 1, 1))


def iou_loss(pred, target):
    """Pallas implementation of _iou(pred, target) (size_average=True)."""
    assert pred.shape == target.shape
    B = pred.shape[0]
    n = 1
    for d in pred.shape[1:]:
        n *= d

    # Native sublane packing of the streamed dtypes (8 f32, 16 bf16, 32 int8).
    pack = 8
    for x in (pred, target):
        pack = max(pack, 8 * max(1, 4 // x.dtype.itemsize))

    n_rows = -(-n // _LANES)                                  # ceil(n / 128)
    tr = min(_MAX_ROWS_PER_TILE, ((n_rows + pack - 1) // pack) * pack)
    n_tiles = -(-n_rows // tr)
    mask_last_tile = (n_rows % tr) != 0

    n_lane_pad = n_rows * _LANES   # pad only within the last 128-lane row

    def _prep(x):
        x = x.reshape(B, n)
        if n_lane_pad != n:
            # <=127 zeros per sample; zeros contribute 0 to both t*p and t+p.
            x = jnp.pad(x, ((0, 0), (0, n_lane_pad - n)))
        return x.reshape(B, n_rows, _LANES)    # free reshape when n % 128 == 0

    pred_f = _prep(pred)      # streamed in native dtype, cast in-kernel
    target_f = _prep(target)

    kernel = functools.partial(
        _iou_kernel, tr=tr, n_rows=n_rows, mask_last_tile=mask_last_tile)

    # Double-buffered input blocks + two (8,128) f32 scratch vregs.
    buf_bytes = 2 * tr * _LANES * (pred.dtype.itemsize + target.dtype.itemsize)
    vmem_limit = min(max(buf_bytes + (4 << 20), 32 << 20), 60 << 20)

    per_sample = pl.pallas_call(
        kernel,
        out_shape=jax.ShapeDtypeStruct((B, 1, 1), jnp.float32),
        grid_spec=pltpu.PrefetchScalarGridSpec(
            num_scalar_prefetch=0,
            grid=(B, n_tiles),
            in_specs=[
                pl.BlockSpec((1, tr, _LANES), lambda b, t: (b, t, 0)),
                pl.BlockSpec((1, tr, _LANES), lambda b, t: (b, t, 0)),
            ],
            out_specs=pl.BlockSpec((1, 1, 1), lambda b, t: (b, 0, 0)),
            scratch_shapes=[
                pltpu.VMEM((8, _LANES), jnp.float32),  # running sum of t*p
                pltpu.VMEM((8, _LANES), jnp.float32),  # running sum of t+p
            ],
        ),
        compiler_params=pltpu.CompilerParams(
            # Batch axis parallel (v7x megacore); pixel reduction axis last.
            dimension_semantics=("parallel", "arbitrary"),
            vmem_limit_bytes=vmem_limit,
        ),
    )(pred_f, target_f)

    return jnp.mean(per_sample)


def _iou_ref(pred, target):
    # Pure-JAX reference matching the PyTorch loop exactly.
    iand = jnp.sum(target * pred, axis=(1, 2, 3))
    ior = jnp.sum(target, axis=(1, 2, 3)) + jnp.sum(pred, axis=(1, 2, 3)) - iand
    return jnp.mean(1.0 - iand / ior)


if __name__ == "__main__":
    key = jax.random.PRNGKey(0)
    k1, k2, k3, k4 = jax.random.split(key, 4)

    # Case 1: n % 128 == 0 (no pad, no mask) — the common fast path.
    B, C, H, W = 2, 4, 16, 16
    pred = jax.nn.sigmoid(jax.random.normal(k1, (B, C, H, W), dtype=jnp.float32))
    target = (jax.random.uniform(k2, (B, C, H, W)) > 0.5).astype(jnp.float32)
    out = jax.block_until_ready(iou_loss(pred, target))
    ref = _iou_ref(pred, target)
    assert jnp.allclose(out, ref, rtol=1e-5, atol=1e-5), (out, ref)

    # Case 2: irregular n (exercises the small lane pad + in-kernel row mask).
    B2, C2, H2, W2 = 2, 3, 21, 13
    pred2 = jax.nn.sigmoid(jax.random.normal(k3, (B2, C2, H2, W2), dtype=jnp.float32))
    target2 = (jax.random.uniform(k4, (B2, C2, H2, W2)) > 0.5).astype(jnp.float32)
    out2 = jax.block_until_ready(iou_loss(pred2, target2))
    ref2 = _iou_ref(pred2, target2)
    assert jnp.allclose(out2, ref2, rtol=1e-5, atol=1e-5), (out2, ref2)

    print("KERNEL_OK")
</pallas_src>

<mosaic_0001>
module attributes {stable_mosaic.version = 11 : i64} {
  func.func @_iou_kernel(%arg0: i32, %arg1: i32, %arg2: memref<1x8x128xf32, #tpu.memory_space<vmem>>, %arg3: memref<1x8x128xf32, #tpu.memory_space<vmem>>, %arg4: memref<1x1x1xf32, #tpu.memory_space<vmem>>, %arg5: memref<8x128xf32, #tpu.memory_space<vmem>>, %arg6: memref<8x128xf32, #tpu.memory_space<vmem>>) attributes {dimension_semantics = [#tpu.dimension_semantics<parallel>, #tpu.dimension_semantics<arbitrary>], iteration_bounds = array<i64: 2, 1>, scalar_prefetch = 0 : i64, scratch_operands = 2 : i64, tpu.core_type = #tpu.core_type<tc>, window_params = [{transform_indices = @transform_0, window_bounds = array<i64: 1, 8, 128>}, {transform_indices = @transform_1, window_bounds = array<i64: 1, 8, 128>}, {transform_indices = @transform_2, window_bounds = array<i64: 1, 1, 1>}]} {
    %c0_i32 = arith.constant 0 : i32
    %0 = arith.cmpi eq, %arg1, %c0_i32 : i32
    %1 = arith.extui %0 : i1 to i32
    %c0_i32_0 = arith.constant 0 : i32
    %2 = arith.cmpi ne, %1, %c0_i32_0 : i32
    scf.if %2 {
      %cst_17 = arith.constant 0.000000e+00 : f32
      %22 = vector.broadcast %cst_17 : f32 to vector<8x128xf32>
      %c0_18 = arith.constant 0 : index
      %c0_19 = arith.constant 0 : index
      %23 = vector.load %arg5[%c0_18, %c0_19] : memref<8x128xf32, #tpu.memory_space<vmem>>, vector<8x128xf32>
      tpu.vector_store %arg5[%c0_18, %c0_19], %22 {strides = array<i32>} : memref<8x128xf32, #tpu.memory_space<vmem>>, vector<8x128xf32>,
      %cst_20 = arith.constant 0.000000e+00 : f32
      %24 = vector.broadcast %cst_20 : f32 to vector<8x128xf32>
      %c0_21 = arith.constant 0 : index
      %c0_22 = arith.constant 0 : index
      %25 = vector.load %arg6[%c0_21, %c0_22] : memref<8x128xf32, #tpu.memory_space<vmem>>, vector<8x128xf32>
      tpu.vector_store %arg6[%c0_21, %c0_22], %24 {strides = array<i32>} : memref<8x128xf32, #tpu.memory_space<vmem>>, vector<8x128xf32>,
    } else {
    }
    %c0 = arith.constant 0 : index
    %c0_1 = arith.constant 0 : index
    %c0_2 = arith.constant 0 : index
    %3 = vector.load %arg2[%c0, %c0_1, %c0_2] : memref<1x8x128xf32, #tpu.memory_space<vmem>>, vector<1x8x128xf32>
    %4 = vector.shape_cast %3 : vector<1x8x128xf32> to vector<8x128xf32>
    %c0_3 = arith.constant 0 : index
    %c0_4 = arith.constant 0 : index
    %c0_5 = arith.constant 0 : index
    %5 = vector.load %arg3[%c0_3, %c0_4, %c0_5] : memref<1x8x128xf32, #tpu.memory_space<vmem>>, vector<1x8x128xf32>
    %6 = vector.shape_cast %5 : vector<1x8x128xf32> to vector<8x128xf32>
    %c0_6 = arith.constant 0 : index
    %c0_7 = arith.constant 0 : index
    %7 = vector.load %arg5[%c0_6, %c0_7] : memref<8x128xf32, #tpu.memory_space<vmem>>, vector<8x128xf32>
    %8 = arith.mulf %6, %4 : vector<8x128xf32>
    %9 = vector.shape_cast %8 : vector<8x128xf32> to vector<1x8x128xf32>
    %cst = arith.constant dense<0.000000e+00> : vector<8x128xf32>
    %10 = vector.multi_reduction <add>, %9, %cst [0] : vector<1x8x128xf32> to vector<8x128xf32>
    %11 = arith.addf %7, %10 : vector<8x128xf32>
    %c0_8 = arith.constant 0 : index
    %c0_9 = arith.constant 0 : index
    %12 = vector.load %arg5[%c0_8, %c0_9] : memref<8x128xf32, #tpu.memory_space<vmem>>, vector<8x128xf32>
    tpu.vector_store %arg5[%c0_8, %c0_9], %11 {strides = array<i32>} : memref<8x128xf32, #tpu.memory_space<vmem>>, vector<8x128xf32>,
    %c0_10 = arith.constant 0 : index
    %c0_11 = arith.constant 0 : index
    %13 = vector.load %arg6[%c0_10, %c0_11] : memref<8x128xf32, #tpu.memory_space<vmem>>, vector<8x128xf32>
    %14 = arith.addf %6, %4 : vector<8x128xf32>
    %15 = vector.shape_cast %14 : vector<8x128xf32> to vector<1x8x128xf32>
    %cst_12 = arith.constant dense<0.000000e+00> : vector<8x128xf32>
    %16 = vector.multi_reduction <add>, %15, %cst_12 [0] : vector<1x8x128xf32> to vector<8x128xf32>
    %17 = arith.addf %13, %16 : vector<8x128xf32>
    %c0_13 = arith.constant 0 : index
    %c0_14 = arith.constant 0 : index
    %18 = vector.load %arg6[%c0_13, %c0_14] : memref<8x128xf32, #tpu.memory_space<vmem>>, vector<8x128xf32>
    tpu.vector_store %arg6[%c0_13, %c0_14], %17 {strides = array<i32>} : memref<8x128xf32, #tpu.memory_space<vmem>>, vector<8x128xf32>,
    %c0_i32_15 = arith.constant 0 : i32
    %19 = arith.cmpi eq, %arg1, %c0_i32_15 : i32
    %20 = arith.extui %19 : i1 to i32
    %c0_i32_16 = arith.constant 0 : i32
    %21 = arith.cmpi ne, %20, %c0_i32_16 : i32
    scf.if %21 {
      %c0_17 = arith.constant 0 : index
      %c0_18 = arith.constant 0 : index
      %22 = vector.load %arg5[%c0_17, %c0_18] : memref<8x128xf32, #tpu.memory_space<vmem>>, vector<8x128xf32>
      %23 = vector.shape_cast %22 : vector<8x128xf32> to vector<1x8x128xf32>
      %cst_19 = arith.constant dense<0.000000e+00> : vector<1xf32>
      %24 = vector.multi_reduction <add>, %23, %cst_19 [1, 2] : vector<1x8x128xf32> to vector<1xf32>
      %25 = vector.shape_cast %24 : vector<1xf32> to vector<1x1x1xf32>
      %26 = vector.extract %25[0, 0, 0] : f32 from vector<1x1x1xf32>
      %c0_20 = arith.constant 0 : index
      %c0_21 = arith.constant 0 : index
      %27 = vector.load %arg6[%c0_20, %c0_21] : memref<8x128xf32, #tpu.memory_space<vmem>>, vector<8x128xf32>
      %28 = vector.shape_cast %27 : vector<8x128xf32> to vector<1x8x128xf32>
      %cst_22 = arith.constant dense<0.000000e+00> : vector<1xf32>
      %29 = vector.multi_reduction <add>, %28, %cst_22 [1, 2] : vector<1x8x128xf32> to vector<1xf32>
      %30 = vector.shape_cast %29 : vector<1xf32> to vector<1x1x1xf32>
      %31 = vector.extract %30[0, 0, 0] : f32 from vector<1x1x1xf32>
      %32 = arith.subf %31, %26 : f32
      %33 = arith.divf %26, %32 : f32
      %cst_23 = arith.constant 1.000000e+00 : f32
      %34 = arith.subf %cst_23, %33 : f32
      %35 = vector.broadcast %34 : f32 to vector<1x1x1xf32>
      %c0_24 = arith.constant 0 : index
      %c0_25 = arith.constant 0 : index
      %c0_26 = arith.constant 0 : index
      %36 = vector.load %arg4[%c0_24, %c0_25, %c0_26] : memref<1x1x1xf32, #tpu.memory_space<vmem>>, vector<1x1x1xf32>
      tpu.vector_store %arg4[%c0_24, %c0_25, %c0_26], %35 {strides = array<i32>} : memref<1x1x1xf32, #tpu.memory_space<vmem>>, vector<1x1x1xf32>,
    } else {
    }
    return
  }
  func.func @transform_0(%arg0: i32, %arg1: i32) -> (i32, i32, i32) {
    %c0_i32 = arith.constant 0 : i32
    %c0_i32_0 = arith.constant 0 : i32
    return %arg0, %arg1, %c0_i32 : i32, i32, i32
  }
  func.func @transform_1(%arg0: i32, %arg1: i32) -> (i32, i32, i32) {
    %c0_i32 = arith.constant 0 : i32
    %c0_i32_0 = arith.constant 0 : i32
    return %arg0, %arg1, %c0_i32 : i32, i32, i32
  }
  func.func @transform_2(%arg0: i32, %arg1: i32) -> (i32, i32, i32) {
    %c0_i32 = arith.constant 0 : i32
    %c0_i32_0 = arith.constant 0 : i32
    %c0_i32_1 = arith.constant 0 : i32
    return %arg0, %c0_i32, %c0_i32_0 : i32, i32, i32
  }
}

</mosaic_0001>

<bundles_post_ra>
// kernel: tpu_custom_call.1
= control target key start
LH: loop header
LB: loop body
LE: loop exit
PB: predicated region body
PF: predicated region fallthrough
CT: control target
= control target key end

     0   :  { %7 = vsyncpa [#allocation5], 0  ;;  %s690_s0 = inlined_call_operand.hbm [shape: f32[2,8,128], index: 0, kind: input, shape index: {}]   ;;  %s691_s1 = inlined_call_operand.hbm [shape: f32[2,8,128], index: 1, kind: input, shape index: {}]   ;;  %s692_s2 = inlined_call_operand.vmem [shape: f32[2,1,1], index: 2, kind: output, shape index: {}]  }
   0x1   :  { %9 = vsyncpa [#allocation5 + $0x1], 0 }
   0x2   :  { %10 = vsyncpa [#allocation7], 0 }
   0x3   :  { %12 = vsyncpa [#allocation7 + $0x1], 0  ;;  %s564_s9 = smov 0   ;;  %s566_s10 = smov 0  }
   0x4   :  { %s568_s11 = smov 0   ;;  %s570_s12 = smov 0  }
   0x5   :  { %s572_s13 = smov 0   ;;  %s574_s14 = smov 0  }
   0x6 LB: > { %s354_s15 = sadd.s32 4294967295, %s545_s14   ;;  %s30_s16 = sadd.s32 1, %s541_s13  ;;  %s545_s14 = sphi %s574_s14, %s18_s14   ;;  %s541_s13 = sphi %s572_s13, %s701_s13   ;;  %s537_s12 = sphi %s570_s12, %s700_s12   ;;  %s533_s11 = sphi %s568_s11, %s699_s11   ;;  %s529_s10 = sphi %s566_s10, %s698_s10   ;;  %s525_s9 = sphi %s564_s9, %s697_s9  }
   0x7   : > { %p32_p0 = scmp.ge.s32.totalorder %s30_s16, 2  ;;  %s39_s17 = sadd.s32 1, %s533_s11 }
   0x8   : > { %p46_p1 = scmp.ne.s32.totalorder %s533_s11, %s529_s10  ;;  %p47_p2 = scmp.eq.s32.totalorder %s545_s14, 0 }
   0x9   : > { %s703_s16 = smov (%p32_p0, %s30_s16), 0  ;;  %p52_p4 = scmp.ne.s32.totalorder %s529_s10, %s525_s9 }
   0xa   : > { %p600_p3 = por %p47_p2, %p46_p1  ;;  %s34_s19 = ssub.s32 %s541_s13, %s703_s16 }
   0xb   : > { %p53_p5 = scmp.eq.s32.totalorder %s354_s15, 0  ;;  %p37_p6 = scmp.eq.s32.totalorder %s34_s19, 0 }
   0xc   : > { %p384_p8 = scmp.lt.s32.totalorder %s545_s14, 2  ;;  %s616_s22 = sand.u32 1, %s533_s11  }
   0xd   : > { %p607_p7 = por %p53_p5, %p52_p4  ;;  %s359_s23 = sshll.u32 %s541_s13, 7 }
   0xe   : > { %s613_s21 = scalar_select %p37_p6, %s533_s11, %s39_s17  }
   0xf   : > { %s358_s24 = sshll.u32 %s616_s22, 3  ;;  %s140_s27 = scalar_lea.hbm %s690_s0, %s359_s23 }
  0x10   : > { %s134_s28 = scalar_lea.vmem [#allocation4], %s358_s24  ;;  %p625_p9 = pnand %p384_p8, %p600_p3 }
  0x11   : > { %s142_s29 = sshll.u32 %s134_s28, 4  ;;  %p362_p10 = scmp.ge.s32.totalorder %s545_s14, 1  ;;  %s143_s29 = int_to_ptr.vmem [resolvable:$true] %s142_s29 }
  0x12   : > { %p166_p11 = scmp.lt.s32.totalorder %s545_s14, 3  ;;  %s131_s3 = scalar_lea.sflag [#allocation5], %s616_s22 }
  0x13   : > { %p437_p12 = pneg %p625_p9  ;;  %s448_s4 = scalar_lea.vmem %s143_s29, 128 }
  0x14   : > { %p449_p13 = scmp.ne.s32.totalorder %s143_s29, %s448_s4  ;;  %s547_s5 = smov [#allocation4]  }
  0x15   : > { %s453_s6 = sshll.u32 %s547_s5, 4  ;;  %s454_s6 = int_to_ptr.vmem [resolvable:$false] %s453_s6 }
  0x16   : > { %p451_p0 = pnand %p449_p13, %p437_p12  ;;  %s455_s7 = scalar_lea.vmem %s454_s6, 256 }
  0x17   : > { %p456_p2 = scmp.lt.s32.totalorder %s143_s29, %s454_s6  ;;  %p457_p3 = scmp.lt.s32.totalorder %s455_s7, %s448_s4 }
  0x18   : > { %p452_p1 = pneg %p451_p0 }
  0x19   : > { %p458_p4 = por %p457_p3, %p456_p2 }
  0x1b   : > { %p459_p5 = pnand %p458_p4, %p452_p1 }
  0x1d   : > { %462 = shalt.err (!%p459_p5)
}
  0x1e   : > { %380 = dma.hbm_to_vmem [thread:$0]  (!%p625_p9), %s140_s27, 128, %s143_s29, %s131_s3  }
  0x1f   : > { %p643_p6 = pnand %p362_p10, %p166_p11  ;;  %s159_s17 = scalar_lea.hbm %s691_s1, %s359_s23 }
  0x20   : > { %s153_s18 = scalar_lea.vmem [#allocation6], %s358_s24  ;;  %s150_s25 = scalar_lea.sflag [#allocation7], %s616_s22 }
  0x21   : > { %s161_s19 = sshll.u32 %s153_s18, 4  ;;  %s548_s27 = smov [#allocation6]   ;;  %s162_s19 = int_to_ptr.vmem [resolvable:$true] %s161_s19 }
  0x22   : > { %s476_s26 = scalar_lea.vmem %s162_s19, 128  ;;  %s481_s28 = sshll.u32 %s548_s27, 4  ;;  %s482_s28 = int_to_ptr.vmem [resolvable:$false] %s481_s28 }
  0x23   : > { %p477_p8 = scmp.ne.s32.totalorder %s162_s19, %s476_s26  ;;  %s483_s29 = scalar_lea.vmem %s482_s28, 256 }
  0x24   : > { %p484_p10 = scmp.lt.s32.totalorder %s162_s19, %s482_s28  ;;  %p485_p11 = scmp.lt.s32.totalorder %s483_s29, %s476_s26 }
  0x25   : > { %p479_p13 = pnand %p477_p8, %p437_p12 }
  0x26   : > { %p486_p1 = por %p485_p11, %p484_p10 }
  0x27   : > { %p480_p0 = pneg %p479_p13 }
  0x29   : > { %p487_p2 = pnand %p486_p1, %p480_p0 }
  0x2b   : > { %490 = shalt.err (!%p487_p2)
}
  0x2c   : > { %383 = dma.hbm_to_vmem [thread:$0]  (!%p625_p9), %s159_s17, 128, %s162_s19, %s150_s25  }
  0x2d   : > { %170 = sbr.rel (%p643_p6) target bundleno = 333 (0x14d), region = 28  ;;  %s172_s22 = sand.u32 (!%p643_p6), 1, %s529_s10  }
  0x2e   : > { %s363_s23 = sshll.u32 (!%p643_p6), %s172_s22, 3  ;;  %s173_s24 = scalar_lea.sflag (!%p643_p6), [#allocation5], %s172_s22 }
  0x2f   : > { %s176_s3 = scalar_lea.vmem (!%p643_p6), [#allocation4], %s363_s23 }
  0x32   : > { %516 = dma.done.wait (%p607_p7), %s173_s24, 128  }
  0x33   : > { %518 = vsyncadd (%p607_p7), %s173_s24, 4294967168  ;;  %s182_s4 = scalar_lea.sflag [#allocation7], %s172_s22  ;;  %s185_s5 = scalar_lea.vmem [#allocation6], %s363_s23 }
  0x34   : > { %520 = dma.done.wait (%p607_p7), %s182_s4, 128  }
  0x35   : > { %522 = vsyncadd (%p607_p7), %s182_s4, 4294967168  ;;  %v218_v0 = vld [vmem:[%s176_s3] sm:$0xff]  ;;  %v219_v1 = vld [vmem:[%s185_s5] sm:$0xff]  ;;  %p209_p7 = scmp.lt.s32.totalorder %s537_s12, 1  ;;  %vm260_vm0 = vcmask 0  }
  0x36   : > { %v221_v2 = vmul.f32 %v219_v1, %v218_v0  ;;  %v226_v3 = vadd.f32 %v219_v1, %v218_v0 }
  0x37   : > { %s705_s12 = smov (!%p209_p7, %s537_s12), 1 }
  0x38   : > { %234 = vadd.xlane.f32.xlu0 %v221_v2  ;;  %s211_s17 = scalar_lea.vmem %s692_s2, %s705_s12 }
  0x3c   : > { %244 = vadd.xlane.f32.xlu0 %v226_v3 }
  0xc1   : > { %v235_v4 = vpop.xlane.xlu0 %234 }
  0xc2   : > { %v236_v5 = vrot.slane %v235_v4, 4 }
  0xc4   : > { %v237_v6 = vadd.f32 %v236_v5, %v235_v4 }
  0xc5   : > { %v245_v7 = vpop.xlane.xlu0 %244 }
  0xc6   : > { %v238_v8 = vrot.slane %v237_v6, 2  ;;  %v246_v9 = vrot.slane %v245_v7, 4 }
  0xc8   : > { %v247_v10 = vadd.f32 %v246_v9, %v245_v7  ;;  %v239_v11 = vadd.f32 %v238_v8, %v237_v6 }
  0xca   : > { %v248_v12 = vrot.slane %v247_v10, 2  ;;  %v240_v13 = vrot.slane %v239_v11, 1 }
  0xcc   : > { %v249_v14 = vadd.f32 %v248_v12, %v247_v10  ;;  %v241_v15 = vadd.f32 %v240_v13, %v239_v11 }
  0xce   : > { %367 = vpush %v241_v15  ;;  %v250_v16 = vrot.slane %v249_v14, 1 }
  0xd0   : > { %v251_v17 = vadd.f32 %v250_v16, %v249_v14 }
  0xd2   : > { %369 = vpush %v251_v17 }
  0xff   : > { %s368_s20 = spop %367 }
 0x103   : > { %s370_s30 = spop %369 }
 0x104   : > { %s253_s6 = ssub.f32 %s370_s30, %s368_s20 }
 0x106   : > { %v254_v18 = vstv %s253_s6 }
 0x107   : > { %433 = vrcp.f32 %v254_v18 }
 0x114   : > { %v434_v19 = vpop.eup %433 }
 0x115   : > { %371 = vpush %v434_v19 }
 0x146   : > { %s372_s7 = spop %371 }
 0x147   : > { %s257_s8 = smul.f32 %s372_s7, %s368_s20 }
 0x149   : > { %s258_s18 = ssub.f32 1.0, %s257_s8 }
 0x14b   : > { %v259_v20 = vstv %s258_s18 }
 0x14c   : > { %261 = vst.msk [vmem:[%s211_s17] sm:$0x1] %vm260_vm0, %v259_v20 }
 0x14d PF: > { %s18_s14 = sadd.s32 1, %s545_s14   ;;  %s697_s9 = smov %s529_s10 }
 0x14e   : > { %p15_p9 = scmp.ge.s32.totalorder %s18_s14, 4   ;;  %s698_s10 = smov %s533_s11 }
 0x14f   : > { %s699_s11 = smov %s613_s21  ;;  %s700_s12 = smov %s541_s13 }
 0x150   : > { %s701_s13 = smov %s703_s16  ;;  %17 = sbr.rel (!%p15_p9) target bundleno = 6 (0x6), region = 89 }
 0x155   :  { %279 = vsyncpa [#allocation5], 1 }
 0x156   :  { %281 = vsyncpa [#allocation5 + $0x1], 1 }
 0x157   :  { %282 = vsyncpa [#allocation7], 1 }
 0x158   :  { %284 = vsyncpa [#allocation7 + $0x1], 1 }

</bundles_post_ra>
